<compile_context>
chip_gen: v6e
topology: v6e:2x2x1
jax: 0.10.0
libtpu: 0.0.40
codegen_flags: <defaults>
</compile_context>

<pallas_src>
import jax
import jax.numpy as jnp
from jax.experimental import pallas as pl
from jax.experimental.pallas import tpu as pltpu


def _nodes_mul_kernel(alpha_ref, x_ref, o_ref):
    # alpha_ref: (BR, 1), x_ref/o_ref: (BR, cols).
    # Single VPU broadcast-multiply per tile; broadcast happens once per block
    # (no in-kernel loop, so nothing to hoist).
    o_ref[...] = alpha_ref[...] * x_ref[...]


def _pick_row_tile(rows, cols, itemsize, target_bytes=2 * 1024 * 1024):
    """Row-tile for ~2 MiB lane-dense x blocks; multiple of 8 (or full extent)."""
    if rows <= 8:
        return rows  # full-extent block (allowed even if rows % 8 != 0)
    br = (target_bytes // max(1, cols * itemsize)) // 8 * 8
    br = max(8, br)
    return min(rows, br)


@jax.jit
def nodes_layer(x, alphas):
    """x: (N, C, H, W), alphas: (C,) -> (N, C, H, W); out = alphas * x."""
    N, C, H, W = x.shape
    rows, cols = N * C, H * W

    # Glue (wrapper-side, one-time): lane-dense 2D view of x and a per-row
    # alpha column.  cols = H*W; when it is a multiple of 128 the output
    # stores are unmasked vst; otherwise the full-extent last dim still
    # satisfies the (8, 128) rule (masked edge stores).
    x2d = x.reshape(rows, cols)
    alpha_col = jnp.broadcast_to(
        alphas.astype(x.dtype)[None, :], (N, C)
    ).reshape(rows, 1)

    itemsize = jnp.dtype(x.dtype).itemsize
    br = _pick_row_tile(rows, cols, itemsize)
    grid = (pl.cdiv(rows, br),)

    out2d = pl.pallas_call(
        _nodes_mul_kernel,
        out_shape=jax.ShapeDtypeStruct((rows, cols), x.dtype),
        grid=grid,
        in_specs=[
            pl.BlockSpec((br, 1), lambda i: (i, 0)),      # per-row alphas
            pl.BlockSpec((br, cols), lambda i: (i, 0)),   # x tile (streamed)
        ],
        out_specs=pl.BlockSpec((br, cols), lambda i: (i, 0)),
        # Reuse x's buffer for the output (in-place when XLA allows it).
        input_output_aliases={1: 0},
        compiler_params=pltpu.CompilerParams(
            dimension_semantics=("parallel",),   # independent row blocks
            vmem_limit_bytes=32 * 1024 * 1024,   # headroom on all generations
        ),
    )(alpha_col, x2d)

    return out2d.reshape(N, C, H, W)


if __name__ == "__main__":
    key = jax.random.PRNGKey(0)
    kx, ka = jax.random.split(key)

    N, C, H, W = 2, 4, 16, 16
    x = jax.random.normal(kx, (N, C, H, W), dtype=jnp.float32)
    # Deterministic "architecture" parameters (per-channel alphas).
    alphas = jax.random.uniform(ka, (C,), dtype=jnp.float32)

    # Reference (torch.mul broadcasting semantics), computed up front.
    ref = alphas[None, :, None, None] * x

    out = nodes_layer(x, alphas)
    jax.block_until_ready(out)

    assert out.shape == (N, C, H, W)
    assert jnp.allclose(out, ref, atol=1e-6), "mismatch vs reference"

    print("KERNEL_OK")
</pallas_src>

<mosaic_0001>
module attributes {stable_mosaic.version = 11 : i64} {
  func.func @_nodes_mul_kernel(%arg0: i32, %arg1: memref<8x1xf32, #tpu.memory_space<vmem>>, %arg2: memref<8x256xf32, #tpu.memory_space<vmem>>, %arg3: memref<8x256xf32, #tpu.memory_space<vmem>>) attributes {dimension_semantics = [#tpu.dimension_semantics<parallel>], iteration_bounds = array<i64: 1>, scalar_prefetch = 0 : i64, scratch_operands = 0 : i64, tpu.core_type = #tpu.core_type<tc>, window_params = [{transform_indices = @transform_0, window_bounds = array<i64: 8, 1>}, {transform_indices = @transform_1, window_bounds = array<i64: 8, 256>}, {transform_indices = @transform_2, window_bounds = array<i64: 8, 256>}]} {
    %c0 = arith.constant 0 : index
    %c0_0 = arith.constant 0 : index
    %0 = vector.load %arg1[%c0, %c0_0] : memref<8x1xf32, #tpu.memory_space<vmem>>, vector<8x1xf32>
    %c0_1 = arith.constant 0 : index
    %c0_2 = arith.constant 0 : index
    %1 = vector.load %arg2[%c0_1, %c0_2] : memref<8x256xf32, #tpu.memory_space<vmem>>, vector<8x256xf32>
    %2 = vector.broadcast %0 : vector<8x1xf32> to vector<8x256xf32>
    %3 = arith.mulf %2, %1 : vector<8x256xf32>
    %c0_3 = arith.constant 0 : index
    %c0_4 = arith.constant 0 : index
    %4 = vector.load %arg3[%c0_3, %c0_4] : memref<8x256xf32, #tpu.memory_space<vmem>>, vector<8x256xf32>
    tpu.vector_store %arg3[%c0_3, %c0_4], %3 {strides = array<i32>} : memref<8x256xf32, #tpu.memory_space<vmem>>, vector<8x256xf32>,
    return
  }
  func.func @transform_0(%arg0: i32) -> (i32, i32) {
    %c0_i32 = arith.constant 0 : i32
    %c0_i32_0 = arith.constant 0 : i32
    return %arg0, %c0_i32 : i32, i32
  }
  func.func @transform_1(%arg0: i32) -> (i32, i32) {
    %c0_i32 = arith.constant 0 : i32
    %c0_i32_0 = arith.constant 0 : i32
    return %arg0, %c0_i32 : i32, i32
  }
  func.func @transform_2(%arg0: i32) -> (i32, i32) {
    %c0_i32 = arith.constant 0 : i32
    %c0_i32_0 = arith.constant 0 : i32
    return %arg0, %c0_i32 : i32, i32
  }
}

</mosaic_0001>

<bundles_post_ra>
// kernel: nodes_layer.1
= control target key start
LH: loop header
LB: loop body
LE: loop exit
PB: predicated region body
PF: predicated region fallthrough
CT: control target
= control target key end

     0   :  { %v29_v0 = vmov 0   ;;  %s60_s0 = inlined_call_operand.vmem [shape: f32[8,1], index: 0, kind: input, shape index: {}]   ;;  %s61_s1 = inlined_call_operand.vmem [shape: f32[8,256], index: 1, kind: input, shape index: {}, may-alias: {1,2}]   ;;  %s62_s2 = inlined_call_operand.vmem [shape: f32[8,256], index: 2, kind: output, shape index: {}, may-alias: {1,2}]  }
   0x1   :  { %28 = vset.pattern.permute.xlu0 %v29_v0  ;;  %v11_v1 = vld [vmem:[%s60_s0] sm:$0xff]  ;;  %v13_v3 = vld [vmem:[%s61_s1 + $0x8] sm:$0xff] }
   0x2   :  { %16 = vperm.xlu0 %28, %v11_v1   ;;  %v12_v2 = vld [vmem:[%s61_s1] sm:$0xff] }
  0x7d   :  { %v17_v4 = vpop.permute.xlu0 %16 }
  0x7e   :  { %v19_v5 = vmul.f32 %v17_v4, %v12_v2  ;;  %v20_v6 = vmul.f32 %v17_v4, %v13_v3 }
  0x80   :  { %21 = vst [vmem:[%s62_s2] sm:$0xff] %v19_v5  ;;  %22 = vst [vmem:[%s62_s2 + $0x8] sm:$0xff] %v20_v6 }

</bundles_post_ra>
